<compile_context>
chip_gen: v7x
topology: tpu7x:2x2x1
jax: 0.10.0
libtpu: 0.0.40
codegen_flags: <defaults>
</compile_context>

<pallas_src>
import functools
import math

import jax
import jax.numpy as jnp
from jax import lax
from jax.experimental import pallas as pl
from jax.experimental.pallas import tpu as pltpu


# ----------------------------------------------------------------------------
# helpers (generation-aware tiling / VMEM budgeting)
# ----------------------------------------------------------------------------
@functools.lru_cache(maxsize=1)
def _vmem_capacity():
    try:
        return int(pltpu.get_tpu_info().vmem_capacity_bytes)
    except Exception:
        return 64 << 20            # conservative fallback (v7x: 64 MiB / TC)


def _is_big_vmem():
    return _vmem_capacity() >= (100 << 20)   # v5e / v6e have 128 MiB per TC


def _default_linear_tiles():
    # (tm, tn, tk): bigger K/N tiles where VMEM allows (amortize grid-step cost)
    return (256, 512, 1024) if _is_big_vmem() else (256, 256, 512)


def _default_attn_tiles():
    # (tq, tkv)
    return (256, 512) if _is_big_vmem() else (256, 256)


def _fit_tile(dim, target):
    """`target` if it evenly divides `dim`, else the full dim (always legal)."""
    return target if (dim > target and dim % target == 0) else dim


def _vmem_limit_bytes(*buf_bytes):
    """Scoped-VMEM request: double-buffered blocks + headroom, capped below the
    queried physical VMEM capacity (64 MiB/TC on v7x, 128 MiB on v5e/v6e)."""
    cap = _vmem_capacity()
    total = 2 * sum(int(b) for b in buf_bytes) + (8 << 20)
    return int(min(max(total, 16 << 20), cap - (8 << 20)))


# ----------------------------------------------------------------------------
# Kernel 1: stacked / fused tiled linear   y[s] = x[s or 0] @ W[s] + b[s]
#           (W is already transposed to (K, N) by the wrapper)
# ----------------------------------------------------------------------------
def _linear_kernel(x_ref, w_ref, b_ref, o_ref, acc_ref):
    k = pl.program_id(3)

    @pl.when(k == 0)
    def _():
        acc_ref[...] = jnp.zeros_like(acc_ref)

    # canonical (tm,tk)@(tk,tn) MXU contraction; inputs already in compute dtype
    acc_ref[...] += jnp.dot(x_ref[...], w_ref[...],
                            preferred_element_type=jnp.float32)

    @pl.when(k == pl.num_programs(3) - 1)
    def _():
        # f32 bias added once per output tile, on the final K step
        o_ref[...] = (acc_ref[...] + b_ref[...]).astype(o_ref.dtype)


def stacked_linear(x3, w3, b3, *, out_dtype, tm=None, tn=None, tk=None):
    """x3: (Sx, M, K) with Sx in {1, S}; w3: (S, K, N); b3: (S, 1, N) f32
    -> (S, M, N) in out_dtype (f32 accumulation inside)."""
    sx, m, kdim = x3.shape
    s, k2, n = w3.shape
    assert kdim == k2 and sx in (1, s)
    tm0, tn0, tk0 = _default_linear_tiles()
    tm = _fit_tile(m, tm or tm0)
    tn = _fit_tile(n, tn or tn0)
    tk = _fit_tile(kdim, tk or tk0)

    if sx == s:
        x_map = lambda si, i, j, kk: (si, i, kk)
    else:  # shared activation (self-attention fused QKV): read x once per tile
        x_map = lambda si, i, j, kk: (0, i, kk)

    xb = jnp.dtype(x3.dtype).itemsize
    wb = jnp.dtype(w3.dtype).itemsize
    ob = jnp.dtype(out_dtype).itemsize
    limit = _vmem_limit_bytes(tm * tk * xb, tk * tn * wb, tn * 4,
                              tm * tn * ob, tm * tn * 4)

    return pl.pallas_call(
        _linear_kernel,
        grid=(s, m // tm, n // tn, kdim // tk),
        in_specs=[
            pl.BlockSpec((None, tm, tk), x_map),
            pl.BlockSpec((None, tk, tn), lambda si, i, j, kk: (si, kk, j)),
            pl.BlockSpec((None, 1, tn), lambda si, i, j, kk: (si, 0, j)),
        ],
        out_specs=pl.BlockSpec((None, tm, tn), lambda si, i, j, kk: (si, i, j)),
        out_shape=jax.ShapeDtypeStruct((s, m, n), out_dtype),
        scratch_shapes=[pltpu.VMEM((tm, tn), jnp.float32)],
        compiler_params=pltpu.CompilerParams(
            dimension_semantics=("parallel", "parallel", "parallel", "arbitrary"),
            vmem_limit_bytes=limit,
        ),
    )(x3, w3, b3)


# ----------------------------------------------------------------------------
# Kernel 2: flash-style multi-head attention (online softmax, no p_attn in HBM)
# ----------------------------------------------------------------------------
def _attn_kernel(*refs, h, d_k, has_bias):
    if has_bias:
        q_ref, k_ref, v_ref, bias_ref, o_ref, m_ref, l_ref, acc_ref = refs
    else:
        q_ref, k_ref, v_ref, o_ref, m_ref, l_ref, acc_ref = refs
        bias_ref = None

    kv = pl.program_id(2)

    @pl.when(kv == 0)
    def _():
        m_ref[...] = jnp.full_like(m_ref, -jnp.inf)
        l_ref[...] = jnp.zeros_like(l_ref)
        acc_ref[...] = jnp.zeros_like(acc_ref)

    tq = q_ref.shape[0]
    tkv = k_ref.shape[0]

    if has_bias:
        # hoist the (1|tq, tkv) -> (tq, tkv) broadcast out of the head loop
        # (JAX does not CSE broadcast_in_dim across the unrolled iterations)
        bias = jnp.broadcast_to(bias_ref[...], (tq, tkv)).astype(jnp.float32)

    for hd in range(h):                               # static unroll over heads
        lo, hi = hd * d_k, (hd + 1) * d_k
        q_h = q_ref[:, lo:hi]                         # (tq, d_k)  (pre-scaled Q)
        k_h = k_ref[:, lo:hi]                         # (tkv, d_k)
        v_h = v_ref[:, lo:hi]                         # (tkv, d_k)

        # q @ k.T with last-dim contraction, f32 accumulate on the MXU.
        s = lax.dot_general(q_h, k_h, (((1,), (1,)), ((), ())),
                            preferred_element_type=jnp.float32)
        if has_bias:
            s = s + bias                              # additive mask bias (0 / -1e9)

        m_prev = m_ref[hd]                            # (tq, 1)
        m_new = jnp.maximum(m_prev, jnp.max(s, axis=-1, keepdims=True))
        alpha = jnp.exp(m_prev - m_new)
        p = jnp.exp(s - m_new)                        # f32 softmax math
        l_ref[hd] = alpha * l_ref[hd] + jnp.sum(p, axis=-1, keepdims=True)
        acc_ref[hd] = alpha * acc_ref[hd] + jnp.dot(
            p.astype(v_h.dtype), v_h, preferred_element_type=jnp.float32)
        m_ref[hd] = m_new

    @pl.when(kv == pl.num_programs(2) - 1)
    def _():
        # lane-dense finalize: normalize per head, concat along lanes, ONE store
        outs = [acc_ref[hd] * pl.reciprocal(l_ref[hd], approx=True)
                for hd in range(h)]
        o_ref[...] = jnp.concatenate(outs, axis=-1).astype(o_ref.dtype)


def flash_attention(q_proj, kv_proj, bias, q_idx, k_idx, v_idx, h, *,
                    out_dtype=None, tq=None, tkv=None):
    """q_proj: (Sq, B, Lq, D); kv_proj: (Skv, B, Lkv, D);
    bias: None, (B, 1, Lkv) or (B, Lq, Lkv) additive f32 mask bias."""
    _, b, lq, d = q_proj.shape
    _, _, lkv, _ = kv_proj.shape
    d_k = d // h
    tq0, tkv0 = _default_attn_tiles()
    tq = _fit_tile(lq, tq or tq0)
    tkv = _fit_tile(lkv, tkv or tkv0)
    out_dtype = out_dtype or q_proj.dtype
    has_bias = bias is not None

    in_specs = [
        pl.BlockSpec((None, None, tq, d), lambda bi, qi, ki: (q_idx, bi, qi, 0)),
        pl.BlockSpec((None, None, tkv, d), lambda bi, qi, ki: (k_idx, bi, ki, 0)),
        pl.BlockSpec((None, None, tkv, d), lambda bi, qi, ki: (v_idx, bi, ki, 0)),
    ]
    args = [q_proj, kv_proj, kv_proj]
    bias_bytes = 0
    if has_bias:
        if bias.shape[1] == 1:        # encoder-style (B, 1, Lkv) mask bias
            in_specs.append(
                pl.BlockSpec((None, 1, tkv), lambda bi, qi, ki: (bi, 0, ki)))
            bias_bytes = tkv * 4
        else:                         # decoder-style (B, Lq, Lkv) mask bias
            in_specs.append(
                pl.BlockSpec((None, tq, tkv), lambda bi, qi, ki: (bi, qi, ki)))
            bias_bytes = tq * tkv * 4
        args.append(bias)

    eb = jnp.dtype(q_proj.dtype).itemsize
    ob = jnp.dtype(out_dtype).itemsize
    limit = _vmem_limit_bytes(tq * d * eb, 2 * tkv * d * eb, bias_bytes,
                              tq * d * ob,
                              (2 * h * tq + h * tq * d_k) * 4)

    kernel = functools.partial(_attn_kernel, h=h, d_k=d_k, has_bias=has_bias)

    return pl.pallas_call(
        kernel,
        grid=(b, lq // tq, lkv // tkv),
        in_specs=in_specs,
        out_specs=pl.BlockSpec((None, tq, d), lambda bi, qi, ki: (bi, qi, 0)),
        out_shape=jax.ShapeDtypeStruct((b, lq, d), out_dtype),
        scratch_shapes=[
            pltpu.VMEM((h, tq, 1), jnp.float32),      # running max m
            pltpu.VMEM((h, tq, 1), jnp.float32),      # running denom l
            pltpu.VMEM((h, tq, d_k), jnp.float32),    # running context acc
        ],
        compiler_params=pltpu.CompilerParams(
            dimension_semantics=("parallel", "parallel", "arbitrary"),
            vmem_limit_bytes=limit,
        ),
    )(*args)


# ----------------------------------------------------------------------------
# MultiHeadedAttention forward
# ----------------------------------------------------------------------------
def multi_headed_attention(params, query, key, value, mask=None,
                           compute_dtype=jnp.bfloat16):
    """query: (B, Lq, d_model); key/value: (B, Lkv, d_model).
    mask: (B, 1, Lkv) or (B, Lq, Lkv) with 1 = keep, 0 = masked; or None.
    compute_dtype: MXU input dtype (bf16 default; accumulation stays f32)."""
    bsz, lq, d_model = query.shape
    lkv = key.shape[1]
    h = params["h"]
    d_k = d_model // h
    scale = 1.0 / math.sqrt(d_k)
    in_dtype = compute_dtype

    # Weight prep (HBM-side, one-time): fold 1/sqrt(d_k) into W_q/b_q, transpose
    # to (K, N) for canonical MXU contraction, cast to the MXU input dtype.
    wq = (params["w_q"] * scale).T.astype(in_dtype)
    bq = (params["b_q"] * scale).astype(jnp.float32)
    wk = params["w_k"].T.astype(in_dtype)
    bk = params["b_k"].astype(jnp.float32)
    wv = params["w_v"].T.astype(in_dtype)
    bv = params["b_v"].astype(jnp.float32)
    wo = params["w_o"].T.astype(in_dtype)
    bo = params["b_o"].astype(jnp.float32)

    if query is key and key is value:
        # Self-attention: fused QKV projection in a single pallas_call; the
        # (3, B, L, d_model) bf16 result feeds the attention index_maps directly.
        w3 = jnp.stack([wq, wk, wv])                   # (3, d_model, d_model)
        b3 = jnp.stack([bq, bk, bv])[:, None, :]       # (3, 1, d_model)
        x_in = query.reshape(1, bsz * lq, d_model).astype(in_dtype)
        qkv = stacked_linear(x_in, w3, b3, out_dtype=in_dtype)
        qkv = qkv.reshape(3, bsz, lq, d_model)
        q_proj, q_idx = qkv, 0
        kv_proj, k_idx, v_idx = qkv, 1, 2
    else:
        # General (cross-attention) path: project Q alone, K/V fused.
        q_proj = stacked_linear(
            query.reshape(1, bsz * lq, d_model).astype(in_dtype),
            wq[None], bq[None, None, :], out_dtype=in_dtype)
        q_proj = q_proj.reshape(1, bsz, lq, d_model)
        q_idx = 0
        w2 = jnp.stack([wk, wv])
        b2 = jnp.stack([bk, bv])[:, None, :]
        if key is value:
            kv_in = key.reshape(1, bsz * lkv, d_model).astype(in_dtype)
        else:
            kv_in = jnp.stack([key.reshape(bsz * lkv, d_model),
                               value.reshape(bsz * lkv, d_model)]).astype(in_dtype)
        kv_proj = stacked_linear(kv_in, w2, b2, out_dtype=in_dtype)
        kv_proj = kv_proj.reshape(2, bsz, lkv, d_model)
        k_idx, v_idx = 0, 1

    # Precompute the mask as an additive f32 bias (0 / -1e9); skip entirely if
    # there is no mask (removes the bias operand + per-head add in the kernel).
    bias = None
    if mask is not None:
        bias = jnp.where(mask == 0, jnp.float32(-1e9), jnp.float32(0.0))

    ctx = flash_attention(q_proj, kv_proj, bias, q_idx, k_idx, v_idx, h,
                          out_dtype=in_dtype)          # (B, Lq, d_model)

    out = stacked_linear(ctx.reshape(1, bsz * lq, d_model),
                         wo[None], bo[None, None, :], out_dtype=jnp.float32)
    return out.reshape(bsz, lq, d_model)


# ----------------------------------------------------------------------------
# Pure-JAX reference
# ----------------------------------------------------------------------------
def _reference(params, query, key, value, mask=None):
    h = params["h"]
    bsz, lq, d_model = query.shape
    d_k = d_model // h

    def proj(x, w, b):
        y = x @ w.T + b
        return y.reshape(bsz, -1, h, d_k).transpose(0, 2, 1, 3)

    q = proj(query, params["w_q"], params["b_q"])
    k = proj(key, params["w_k"], params["b_k"])
    v = proj(value, params["w_v"], params["b_v"])
    scores = jnp.einsum("bhqd,bhkd->bhqk", q, k) / math.sqrt(d_k)
    if mask is not None:
        scores = jnp.where(mask[:, None, :, :] == 0, -1e9, scores)
    p = jax.nn.softmax(scores, axis=-1)
    x = jnp.einsum("bhqk,bhkd->bhqd", p, v)
    x = x.transpose(0, 2, 1, 3).reshape(bsz, lq, d_model)
    return x @ params["w_o"].T + params["b_o"]


# ----------------------------------------------------------------------------
def init_params(key, h, d_model):
    ks = jax.random.split(key, 8)
    scale = 1.0 / math.sqrt(d_model)

    def w(k):
        return (jax.random.uniform(k, (d_model, d_model), jnp.float32) * 2 - 1) * scale

    def b(k):
        return (jax.random.uniform(k, (d_model,), jnp.float32) * 2 - 1) * scale

    return {
        "h": h,
        "w_q": w(ks[0]), "b_q": b(ks[1]),
        "w_k": w(ks[2]), "b_k": b(ks[3]),
        "w_v": w(ks[4]), "b_v": b(ks[5]),
        "w_o": w(ks[6]), "b_o": b(ks[7]),
    }


if __name__ == "__main__":
    B, L, d_model, h = 2, 8, 32, 4

    root = jax.random.PRNGKey(0)
    k_par, k_x, k_q, k_kv = jax.random.split(root, 4)
    params = init_params(k_par, h, d_model)

    # 1) self-attention (encoder-layer usage) with an encoder-style mask, f32 path
    x = jax.random.normal(k_x, (B, L, d_model), jnp.float32)
    mask = jnp.ones((B, 1, L), dtype=jnp.int32)
    mask = mask.at[1, 0, L - 2:].set(0)

    out_f32 = jax.block_until_ready(
        multi_headed_attention(params, x, x, x, mask, compute_dtype=jnp.float32))
    ref = _reference(params, x, x, x, mask)
    assert out_f32.shape == (B, L, d_model)
    assert jnp.allclose(out_f32, ref, atol=2e-2, rtol=2e-2), \
        float(jnp.max(jnp.abs(out_f32 - ref)))

    # 2) cross-attention: distinct query and (longer) key/value source, f32 path
    Ls = 16
    q_in = jax.random.normal(k_q, (B, L, d_model), jnp.float32)
    kv_in = jax.random.normal(k_kv, (B, Ls, d_model), jnp.float32)
    mask2 = jnp.ones((B, 1, Ls), dtype=jnp.int32)
    mask2 = mask2.at[0, 0, Ls - 3:].set(0)

    out2 = jax.block_until_ready(
        multi_headed_attention(params, q_in, kv_in, kv_in, mask2,
                               compute_dtype=jnp.float32))
    ref2 = _reference(params, q_in, kv_in, kv_in, mask2)
    assert jnp.allclose(out2, ref2, atol=2e-2, rtol=2e-2), \
        float(jnp.max(jnp.abs(out2 - ref2)))

    # 3) default bf16 MXU-input path (f32 accumulation + f32 softmax stats)
    out_bf16 = jax.block_until_ready(multi_headed_attention(params, x, x, x, mask))
    assert jnp.allclose(out_bf16, ref, atol=1e-1, rtol=1e-1), \
        float(jnp.max(jnp.abs(out_bf16 - ref)))

    # 4) mask=None path (bias operand and add are skipped in the kernel)
    out_nomask = jax.block_until_ready(multi_headed_attention(params, x, x, x, None))
    ref_nomask = _reference(params, x, x, x, None)
    assert jnp.allclose(out_nomask, ref_nomask, atol=1e-1, rtol=1e-1), \
        float(jnp.max(jnp.abs(out_nomask - ref_nomask)))

    print("KERNEL_OK")
</pallas_src>

<mosaic_0001>
module attributes {stable_mosaic.version = 11 : i64} {
  func.func @_linear_kernel(%arg0: i32, %arg1: i32, %arg2: i32, %arg3: i32, %arg4: memref<1x16x32xf32, #tpu.memory_space<vmem>>, %arg5: memref<1x32x32xf32, #tpu.memory_space<vmem>>, %arg6: memref<1x1x32xf32, #tpu.memory_space<vmem>>, %arg7: memref<1x16x32xf32, #tpu.memory_space<vmem>>, %arg8: memref<16x32xf32, #tpu.memory_space<vmem>>) attributes {dimension_semantics = [#tpu.dimension_semantics<parallel>, #tpu.dimension_semantics<parallel>, #tpu.dimension_semantics<parallel>, #tpu.dimension_semantics<arbitrary>], iteration_bounds = array<i64: 3, 1, 1, 1>, scalar_prefetch = 0 : i64, scratch_operands = 1 : i64, tpu.core_type = #tpu.core_type<tc>, window_params = [{transform_indices = @transform_0, window_bounds = array<i64: 1, 16, 32>}, {transform_indices = @transform_1, window_bounds = array<i64: 1, 32, 32>}, {transform_indices = @transform_2, window_bounds = array<i64: 1, 1, 32>}, {transform_indices = @transform_3, window_bounds = array<i64: 1, 16, 32>}]} {
    %c0_i32 = arith.constant 0 : i32
    %0 = arith.cmpi eq, %arg3, %c0_i32 : i32
    %1 = arith.extui %0 : i1 to i32
    %c0_i32_0 = arith.constant 0 : i32
    %2 = arith.cmpi ne, %1, %c0_i32_0 : i32
    scf.if %2 {
      %cst_12 = arith.constant 0.000000e+00 : f32
      %14 = vector.broadcast %cst_12 : f32 to vector<16x32xf32>
      %c0_13 = arith.constant 0 : index
      %c0_14 = arith.constant 0 : index
      %15 = vector.load %arg8[%c0_13, %c0_14] : memref<16x32xf32, #tpu.memory_space<vmem>>, vector<16x32xf32>
      tpu.vector_store %arg8[%c0_13, %c0_14], %14 {strides = array<i32>} : memref<16x32xf32, #tpu.memory_space<vmem>>, vector<16x32xf32>,
    } else {
    }
    %c0 = arith.constant 0 : index
    %c0_1 = arith.constant 0 : index
    %3 = vector.load %arg8[%c0, %c0_1] : memref<16x32xf32, #tpu.memory_space<vmem>>, vector<16x32xf32>
    %c0_2 = arith.constant 0 : index
    %c0_3 = arith.constant 0 : index
    %c0_4 = arith.constant 0 : index
    %4 = vector.load %arg4[%c0_2, %c0_3, %c0_4] : memref<1x16x32xf32, #tpu.memory_space<vmem>>, vector<1x16x32xf32>
    %5 = vector.shape_cast %4 : vector<1x16x32xf32> to vector<16x32xf32>
    %c0_5 = arith.constant 0 : index
    %c0_6 = arith.constant 0 : index
    %c0_7 = arith.constant 0 : index
    %6 = vector.load %arg5[%c0_5, %c0_6, %c0_7] : memref<1x32x32xf32, #tpu.memory_space<vmem>>, vector<1x32x32xf32>
    %7 = vector.shape_cast %6 : vector<1x32x32xf32> to vector<32x32xf32>
    %cst = arith.constant dense<0.000000e+00> : vector<16x32xf32>
    %8 = tpu.matmul %5, %7, %cst {dimension_numbers = #tpu.dot_dimension_numbers<[1], [0], [0], [1], [0, 0, 1, 1], [], []>} : vector<16x32xf32>, vector<32x32xf32>, vector<16x32xf32> -> vector<16x32xf32>
    %9 = arith.addf %3, %8 : vector<16x32xf32>
    %c0_8 = arith.constant 0 : index
    %c0_9 = arith.constant 0 : index
    %10 = vector.load %arg8[%c0_8, %c0_9] : memref<16x32xf32, #tpu.memory_space<vmem>>, vector<16x32xf32>
    tpu.vector_store %arg8[%c0_8, %c0_9], %9 {strides = array<i32>} : memref<16x32xf32, #tpu.memory_space<vmem>>, vector<16x32xf32>,
    %c0_i32_10 = arith.constant 0 : i32
    %11 = arith.cmpi eq, %arg3, %c0_i32_10 : i32
    %12 = arith.extui %11 : i1 to i32
    %c0_i32_11 = arith.constant 0 : i32
    %13 = arith.cmpi ne, %12, %c0_i32_11 : i32
    scf.if %13 {
      %c0_12 = arith.constant 0 : index
      %c0_13 = arith.constant 0 : index
      %14 = vector.load %arg8[%c0_12, %c0_13] : memref<16x32xf32, #tpu.memory_space<vmem>>, vector<16x32xf32>
      %c0_14 = arith.constant 0 : index
      %c0_15 = arith.constant 0 : index
      %c0_16 = arith.constant 0 : index
      %15 = vector.load %arg6[%c0_14, %c0_15, %c0_16] : memref<1x1x32xf32, #tpu.memory_space<vmem>>, vector<1x1x32xf32>
      %16 = vector.shape_cast %15 : vector<1x1x32xf32> to vector<1x32xf32>
      %17 = vector.broadcast %16 : vector<1x32xf32> to vector<16x32xf32>
      %18 = arith.addf %14, %17 : vector<16x32xf32>
      %c0_17 = arith.constant 0 : index
      %c0_18 = arith.constant 0 : index
      %c0_19 = arith.constant 0 : index
      %19 = vector.load %arg7[%c0_17, %c0_18, %c0_19] : memref<1x16x32xf32, #tpu.memory_space<vmem>>, vector<1x16x32xf32>
      %20 = vector.shape_cast %19 : vector<1x16x32xf32> to vector<16x32xf32>
      %21 = vector.shape_cast %18 : vector<16x32xf32> to vector<1x16x32xf32>
      tpu.vector_store %arg7[%c0_17, %c0_18, %c0_19], %21 {strides = array<i32>} : memref<1x16x32xf32, #tpu.memory_space<vmem>>, vector<1x16x32xf32>,
    } else {
    }
    return
  }
  func.func @transform_0(%arg0: i32, %arg1: i32, %arg2: i32, %arg3: i32) -> (i32, i32, i32) {
    %c0_i32 = arith.constant 0 : i32
    %c0_i32_0 = arith.constant 0 : i32
    return %c0_i32, %arg1, %arg3 : i32, i32, i32
  }
  func.func @transform_1(%arg0: i32, %arg1: i32, %arg2: i32, %arg3: i32) -> (i32, i32, i32) {
    %c0_i32 = arith.constant 0 : i32
    return %arg0, %arg3, %arg2 : i32, i32, i32
  }
  func.func @transform_2(%arg0: i32, %arg1: i32, %arg2: i32, %arg3: i32) -> (i32, i32, i32) {
    %c0_i32 = arith.constant 0 : i32
    %c0_i32_0 = arith.constant 0 : i32
    return %arg0, %c0_i32, %arg2 : i32, i32, i32
  }
  func.func @transform_3(%arg0: i32, %arg1: i32, %arg2: i32, %arg3: i32) -> (i32, i32, i32) {
    %c0_i32 = arith.constant 0 : i32
    return %arg0, %arg1, %arg2 : i32, i32, i32
  }
}

</mosaic_0001>

<bundles_post_ra>
// kernel: tpu_custom_call.1
= control target key start
LH: loop header
LB: loop body
LE: loop exit
PB: predicated region body
PF: predicated region fallthrough
CT: control target
= control target key end

     0   :  { %8 = vsyncpa [#allocation4], 0  ;;  %s1073_s0 = inlined_call_operand.hbm [shape: f32[1,16,32], index: 0, kind: input, shape index: {}]   ;;  %s1074_s1 = inlined_call_operand.hbm [shape: f32[3,32,32], index: 1, kind: input, shape index: {}]   ;;  %s1075_s2 = inlined_call_operand.vmem [shape: f32[3,1,32], index: 2, kind: input, shape index: {}]   ;;  %s1076_s3 = inlined_call_operand.hbm [shape: f32[3,16,32], index: 3, kind: output, shape index: {}]  }
   0x1   :  { %9 = vsyncpa [#allocation7], 0 }
   0x2   :  { %11 = vsyncpa [#allocation7 + $0x1], 0 }
   0x3   :  { %12 = vsyncpa [#allocation5], 0 }
   0x4   :  { %14 = vsyncpa [#allocation5 + $0x1], 0  ;;  %s836_s12 = smov 0   ;;  %s838_s13 = smov 0  }
   0x5   :  { %s840_s14 = smov 0   ;;  %s842_s15 = smov 0  }
   0x6   :  { %s844_s16 = smov 0   ;;  %s846_s17 = smov 0  }
   0x7 LB: > { %s537_s18 = sadd.s32 4294967295, %s806_s17   ;;  %s538_s19 = sadd.s32 4294967294, %s806_s17   ;;  %s806_s17 = sphi %s846_s17, %s20_s17   ;;  %s802_s16 = sphi %s844_s16, %s1099_s16   ;;  %s798_s15 = sphi %s842_s15, %s1098_s15   ;;  %s794_s14 = sphi %s840_s14, %s1097_s14   ;;  %s790_s13 = sphi %s838_s13, %s1096_s13   ;;  %s786_s12 = sphi %s836_s12, %s1095_s12  }
   0x8   : > { %p98_p0 = scmp.ne.s32.totalorder %s790_s13, %s786_s12  ;;  %p870_p1 = scmp.eq.s32.totalorder %s537_s18, 0 }
   0x9   : > { %p874_p2 = scmp.eq.s32.totalorder %s537_s18, 2  ;;  %p160_p3 = scmp.eq.s32.totalorder %s538_s19, 2 }
   0xa   : > { %s1081_s20 = scalar_select %p870_p1, 1, 0 }
   0xb   : > { %s1082_s21 = scalar_select %p874_p2, 1, 0 }
   0xc   : > { %p880_p4 = por %p870_p1, %p98_p0  ;;  %p539_p5 = scmp.ge.s32.totalorder %s806_s17, 1 }
   0xd   : > { %p885_p6 = por %p160_p3, %p98_p0  ;;  %p167_p7 = scmp.lt.s32.totalorder %s806_s17, 4 }
   0xe   : > { %s1083_s22 = scalar_select %p880_p4, 1, 0 }
   0xf   : > { %s1084_s23 = scalar_select %p885_p6, 1, 0 }
  0x10   : > { %p890_p8 = pnand %p539_p5, %p167_p7  ;;  %s808_s25 = smov [#allocation3]  }
  0x11   : > { %s183_s26 = sshll.u32 %s808_s25, 4  ;;  %s46_s28 = sadd.s32 1, %s802_s16  ;;  %s184_s26 = int_to_ptr.vmem [resolvable:$true] %s183_s26 }
  0x12   : > { %s1085_s24 = scalar_select %p890_p8, 1, 0 }
  0x13   : > { %p592_p9 = pneg %p890_p8  ;;  %s662_s4 = scalar_lea.hbm %s1073_s0, 256 }
  0x14   : > { %p663_p11 = scmp.ne.s32.totalorder %s1073_s0, %s662_s4  ;;  %p669_p3 = scmp.lt.u32.totalorder %s662_s4, %s1073_s0 }
  0x15   : > { %p898_p10 = pnand %p592_p9, %p870_p1 }
  0x17   : > { %p664_p12 = pneg %p898_p10 }
  0x19   : > { %p665_p13 = pnand %p664_p12, %p663_p11 }
  0x1b   : > { %p666_p0 = pneg %p665_p13 }
  0x1d   : > { %p671_p5 = pnand %p669_p3, %p666_p0 }
  0x1f   : > { %674 = shalt.err (!%p671_p5)
}
  0x20   : > { %s675_s9 = scalar_lea.vmem %s184_s26, 256  ;;  %p683_p4 = scmp.lt.s32.totalorder %s184_s26, %s184_s26 }
  0x21   : > { %p676_p7 = scmp.ne.s32.totalorder %s184_s26, %s675_s9  ;;  %p684_p1 = scmp.lt.s32.totalorder %s675_s9, %s675_s9 }
  0x23   : > { %p678_p9 = pnand %p676_p7, %p664_p12  ;;  %p685_p8 = por %p684_p1, %p683_p4 }
  0x25   : > { %p679_p6 = pneg %p678_p9 }
  0x27   : > { %p686_p2 = pnand %p685_p8, %p679_p6 }
  0x29   : > { %689 = shalt.err (!%p686_p2)
}
  0x2a   : > { %s809_s10 = smov 128   ;;  %s810_s11 = smov 8  }
  0x2b   : > { %595 = dma.hbm_to_vmem [thread:$0]  (!%p898_p10), %s1073_s0, 256, %s184_s26, [#allocation4], %s809_s10, %s809_s10, %s810_s11  }
  0x2c   : > { %p48_p1 = scmp.ge.s32.totalorder %s46_s28, 3  ;;  %s85_s25 = sadd.s32 1, %s794_s14 }
  0x2d   : > { %p92_p2 = scmp.ne.s32.totalorder %s794_s14, %s790_s13  ;;  %p93_p4 = scmp.eq.s32.totalorder %s806_s17, 0 }
  0x2e   : > { %s1101_s28 = smov (%p48_p1, %s46_s28), 0  ;;  %p1088_p8 = scmp.ne.s32.totalorder %s1082_s21, 0 }
  0x2f   : > { %p928_p6 = por %p93_p4, %p92_p2  ;;  %s78_s30 = ssub.s32 %s802_s16, %s1101_s28 }
  0x30   : > { %p934_p11 = por %p1088_p8, %p92_p2  ;;  %p605_p12 = scmp.lt.s32.totalorder %s806_s17, 3 }
  0x31   : > { %p83_p10 = scmp.eq.s32.totalorder %s78_s30, 0  ;;  %s197_s26 = sand.u32 1, %s794_s14  }
  0x32   : > { %s542_s4 = sshll.u32 %s197_s26, 5  ;;  %s557_s6 = sshll.u32 %s802_s16, 9 }
  0x33   : > { %s943_s5 = scalar_select %p83_p10, %s794_s14, %s85_s25  }
  0x34   : > { %s949_s9 = scalar_lea.hbm %s1074_s1, %s557_s6  ;;  %s201_s21 = scalar_lea.vmem [#allocation6], %s542_s4 }
  0x35   : > { %s211_s18 = sshll.u32 %s201_s21, 4  ;;  %p955_p13 = pnand %p605_p12, %p928_p6  ;;  %s951_s18 = int_to_ptr.vmem [resolvable:$true] %s211_s18 }
  0x36   : > { %s959_s25 = scalar_lea.sflag [#allocation7], %s197_s26  ;;  %s690_s30 = scalar_lea.hbm %s949_s9, 512 }
  0x37   : > { %p691_p0 = scmp.ne.s32.totalorder %s949_s9, %s690_s30  ;;  %p692_p3 = pneg %p955_p13 }
  0x38   : > { %s695_s29 = scalar_lea.hbm %s1074_s1, 1536  ;;  %p696_p9 = scmp.lt.u32.totalorder %s949_s9, %s1074_s1 }
  0x39   : > { %p693_p5 = pnand %p692_p3, %p691_p0  ;;  %p697_p1 = scmp.lt.u32.totalorder %s695_s29, %s690_s30 }
  0x3a   : > { %p699_p4 = scmp.lt.u32.totalorder %s690_s30, %s949_s9 }
  0x3b   : > { %p694_p7 = pneg %p693_p5  ;;  %p698_p2 = por %p697_p1, %p696_p9 }
  0x3d   : > { %p700_p6 = por %p699_p4, %p698_p2 }
  0x3f   : > { %p701_p8 = pnand %p700_p6, %p694_p7 }
  0x41   : > { %704 = shalt.err (!%p701_p8)
}
  0x42   : > { %s705_s26 = scalar_lea.vmem %s951_s18, 512  ;;  %s811_s21 = smov [#allocation6]  }
  0x43   : > { %p706_p12 = scmp.ne.s32.totalorder %s951_s18, %s705_s26  ;;  %s710_s4 = sshll.u32 %s811_s21, 4  ;;  %s711_s4 = int_to_ptr.vmem [resolvable:$false] %s710_s4 }
  0x44   : > { %s712_s6 = scalar_lea.vmem %s711_s4, 1024  ;;  %p713_p5 = scmp.lt.s32.totalorder %s951_s18, %s711_s4 }
  0x45   : > { %p708_p10 = pnand %p706_p12, %p692_p3  ;;  %p714_p9 = scmp.lt.s32.totalorder %s712_s6, %s705_s26 }
  0x47   : > { %p709_p0 = pneg %p708_p10  ;;  %p715_p1 = por %p714_p9, %p713_p5 }
  0x49   : > { %p716_p2 = pnand %p715_p1, %p709_p0 }
  0x4b   : > { %719 = shalt.err (!%p716_p2)
}
  0x4c   : > { %599 = dma.hbm_to_vmem [thread:$0]  (!%p955_p13), %s949_s9, 512, %s951_s18, %s959_s25, %s809_s10, %s809_s10, %s810_s11  }
  0x4d   : > { %p1091_p3 = scmp.ne.s32.totalorder %s1085_s24, 0 }
  0x4e   : > { %p1092_p7 = scmp.ne.s32.totalorder (!%p1091_p3), %s1081_s20, 0 }
  0x4f   : > { %232 = sbr.rel (%p1091_p3) target bundleno = 342 (0x156), region = 32 }
  0x56   : > { %773 = dma.done.wait (%p1092_p7), [#allocation4], 256  }
  0x57   : > { %775 = vsyncadd (%p1092_p7), [#allocation4], 4294967040  ;;  %s997_s30 = sand.u32 1, %s790_s13   ;;  %p1093_p4 = scmp.ne.s32.totalorder %s1083_s22, 0 }
  0x58   : > { %s547_s19 = sshll.u32 %s997_s30, 5  ;;  %s239_s29 = scalar_lea.sflag [#allocation7], %s997_s30 }
  0x59   : > { %s242_s7 = scalar_lea.vmem [#allocation6], %s547_s19 }
  0x5a   : > { %777 = dma.done.wait (%p1093_p4), %s239_s29, 512  }
  0x5b   : > { %779 = vsyncadd (%p1093_p4), %s239_s29, 4294966784  ;;  %vm284_vm0 = vcmask 261120   ;;  %v812_v0 = vmov 0.0   ;;  %v291_v1 = vld [vmem:[%s242_s7] sm:$0xff]  ;;  %v292_v2 = vld [vmem:[%s242_s7 + $0x8] sm:$0xff]  ;;  %p273_p13 = scmp.lt.s32.totalorder %s798_s15, 2 }
  0x5c   : > { %286 = vst.msk [vmem:[#allocation2 + $0x8] sm:$0xff] %vm284_vm0, %v812_v0  ;;  %285 = vst.msk [vmem:[#allocation2] sm:$0xff] %vm284_vm0, %v812_v0  ;;  %v293_v3 = vld [vmem:[%s242_s7 + $0x10] sm:$0xff]  ;;  %v576_v4 = vpack.c.bf16 %v292_v2, %v291_v1  ;;  %v294_v5 = vld [vmem:[%s242_s7 + $0x18] sm:$0xff]  ;;  %s548_s22 = sshll.u32 %s997_s30, 4  ;;  %s558_s9 = sshll.u32 %s798_s15, 8 }
  0x5d   : > { %v289_v6 = vld [vmem:[#allocation3] sm:$0xff]  ;;  %v580_v7 = vpack.c.bf16 %v294_v5, %v293_v3  ;;  %v290_v8 = vld [vmem:[#allocation3 + $0x8] sm:$0xff]  ;;  %s274_s20 = scalar_select %p273_p13, %s798_s15, 2 }
  0x5e   : > { %573 = vmatprep.mubr.msk.f32.mxu0 %vm284_vm0, %v289_v6  ;;  %577 = vmatprep.subr.bf16.mxu0 %v576_v4  ;;  %s270_s18 = scalar_lea.vmem [#allocation8], %s548_s22  ;;  %s1021_s21 = scalar_lea.hbm %s1076_s3, %s558_s9 }
  0x5f   : > { %579 = vmatpush3.bf16.msra.mxu0 %v576_v4  ;;  %s278_s11 = scalar_lea.vmem %s1075_s2, %s274_s20  ;;  %s414_s25 = sshll.u32 %s270_s18, 4  ;;  %s1023_s25 = int_to_ptr.vmem [resolvable:$true] %s414_s25 }
  0x60   : > { %581 = vmatprep.subr.bf16.mxu0 %v580_v7  ;;  %v551_v15 = vld [vmem:[%s278_s11] ss:$0 sm:$0xff]  ;;  %s398_s15 = scalar_lea.sflag [#allocation5], %s997_s30  ;;  %s720_s4 = scalar_lea.vmem %s1023_s25, 256 }
  0x61   : > { %p721_p6 = scmp.ne.s32.totalorder %s1023_s25, %s720_s4  ;;  %s813_s6 = smov [#allocation8]  }
  0x62   : > { %s724_s19 = sshll.u32 %s813_s6, 4  ;;  %s725_s19 = int_to_ptr.vmem [resolvable:$false] %s724_s19 }
  0x63   : > { %583 = vmatpush3.bf16.msra.mxu0 %v580_v7  ;;  %v288_v9 = vld [vmem:[#allocation2 + $0x8] sm:$0xff]  ;;  %v287_v10 = vld [vmem:[#allocation2] sm:$0xff]  ;;  %p722_p8 = pnand %p721_p6, %p934_p11  ;;  %s726_s29 = scalar_lea.vmem %s725_s19, 512 }
  0x64   : > { %p727_p10 = scmp.lt.s32.totalorder %s1023_s25, %s725_s19  ;;  %p728_p0 = scmp.lt.s32.totalorder %s726_s29, %s720_s4 }
  0x65   : > { %p723_p12 = pneg %p722_p8 }
  0x66   : > { %574 = vmatmul.mubr.msk.f32.vlgmr.msra.gmra.mrb[0].mxu0 %vm284_vm0, %v290_v8  ;;  %p729_p5 = por %p728_p0, %p727_p10 }
  0x68   : > { %p730_p9 = pnand %p729_p5, %p723_p12 }
 0x139   : > { %v575_v11 = vpop.f32.mrb[0].mxu0 }
 0x13a   : > { %v378_v12 = vadd.f32 %v575_v11, %v288_v9  ;;  %v368_v13 = vpop.f32.mrb[1].mxu0 }
 0x13b   : > { %v377_v14 = vadd.f32 %v368_v13, %v287_v10 }
 0x13c   : > { %380 = vst.msk [vmem:[#allocation2 + $0x8] sm:$0xff] %vm284_vm0, %v378_v12 }
 0x13d   : > { %379 = vst.msk [vmem:[#allocation2] sm:$0xff] %vm284_vm0, %v377_v14 }
 0x143   : > { %v385_v16 = vld [vmem:[#allocation2 + $0x8] sm:$0xff] }
 0x144   : > { %v384_v17 = vld [vmem:[#allocation2] sm:$0xff]  ;;  %v394_v18 = vadd.f32 %v551_v15, %v385_v16 }
 0x145   : > { %v393_v19 = vadd.f32 %v551_v15, %v384_v17 }
 0x146   : > { %396 = vst.msk [vmem:[%s270_s18 + $0x8] sm:$0xff] %vm284_vm0, %v394_v18 }
 0x147   : > { %395 = vst.msk [vmem:[%s270_s18] sm:$0xff] %vm284_vm0, %v393_v19 }
 0x148   : > { %733 = shalt.err (!%p730_p9)
}
 0x149   : > { %s734_s7 = scalar_lea.hbm %s1021_s21, 256  ;;  %s738_s24 = scalar_lea.hbm %s1076_s3, 768 }
 0x14a   : > { %p735_p1 = scmp.ne.s32.totalorder %s1021_s21, %s734_s7  ;;  %p739_p7 = scmp.lt.u32.totalorder %s1021_s21, %s1076_s3 }
 0x14b   : > { %p740_p4 = scmp.lt.u32.totalorder %s738_s24, %s734_s7  ;;  %p742_p6 = scmp.lt.u32.totalorder %s734_s7, %s1021_s21 }
 0x14c   : > { %p736_p2 = pnand %p735_p1, %p934_p11 }
 0x14d   : > { %p741_p13 = por %p740_p4, %p739_p7 }
 0x14e   : > { %p737_p3 = pneg %p736_p2 }
 0x14f   : > { %p743_p8 = por %p742_p6, %p741_p13 }
 0x151   : > { %p744_p12 = pnand %p743_p8, %p737_p3 }
 0x153   : > { %747 = shalt.err (!%p744_p12)
}
 0x154   : > { %s814_s9 = smov 128   ;;  %s815_s18 = smov 8  }
 0x155   : > { %590 = dma.vmem_to_hbm [thread:$0]  (%p934_p11), %s1023_s25, 256, %s1021_s21, %s398_s15, %s814_s9, %s814_s9, %s815_s18  }
 0x156 PF: > { %p607_p10 = scmp.ge.s32.totalorder %s806_s17, 2  ;;  %s429_s8 = sand.u32 1, %s786_s12  }
 0x157   : > { %p1094_p0 = scmp.ne.s32.totalorder %s1084_s23, 0  ;;  %s430_s26 = scalar_lea.sflag [#allocation5], %s429_s8 }
 0x159   : > { %p601_p5 = pnand %p607_p10, %p1094_p0 }
 0x15b   : > { %781 = dma.done.wait (!%p601_p5), %s430_s26, 256  }
 0x15c   : > { %783 = vsyncadd (!%p601_p5), %s430_s26, 4294967040  ;;  %s20_s17 = sadd.s32 1, %s806_s17   ;;  %s1095_s12 = smov %s790_s13 }
 0x15d   : > { %p17_p9 = scmp.ge.s32.totalorder %s20_s17, 5   ;;  %s1096_s13 = smov %s794_s14 }
 0x15e   : > { %s1097_s14 = smov %s943_s5  ;;  %s1098_s15 = smov %s802_s16 }
 0x15f   : > { %s1099_s16 = smov %s1101_s28  ;;  %19 = sbr.rel (!%p17_p9) target bundleno = 7 (0x7), region = 94 }
 0x166   :  { %435 = vsyncpa [#allocation4], 1 }
 0x167   :  { %437 = vsyncpa [#allocation4 + $0x1], 1 }
 0x168   :  { %438 = vsyncpa [#allocation7], 1 }
 0x169   :  { %440 = vsyncpa [#allocation7 + $0x1], 1 }
 0x16a   :  { %441 = vsyncpa [#allocation5], 1 }
 0x16b   :  { %443 = vsyncpa [#allocation5 + $0x1], 1 }

</bundles_post_ra>
